<compile_context>
chip_gen: v6e
topology: v6e:2x2x1
jax: 0.10.0
libtpu: 0.0.40
codegen_flags: <defaults>
</compile_context>

<pallas_src>
import functools

import jax
import jax.numpy as jnp
from jax.experimental import pallas as pl
from jax.experimental.pallas import tpu as pltpu

# Small demo shapes consistent with the module.
B, N_FEATURES, N_CLASSES = 2, 32, 4


def _round_up(x, m):
    return (x + m - 1) // m * m


def linear_kernel(x_ref, w_ref, b_ref, out_ref):
    # One (tb, d) bf16 batch tile against the resident (d, n) bf16 weight:
    # a single MXU pass with f32 accumulation, a VPU f32 bias add, and a
    # (possibly masked) store of the (tb, n) logits tile.
    out_ref[...] = (
        jnp.dot(x_ref[...], w_ref[...], preferred_element_type=jnp.float32)
        + b_ref[...]
    ).astype(out_ref.dtype)


@functools.partial(jax.jit, static_argnames=("block_b",))
def linear_classifier_forward(X, _, w, b, *, block_b=1024):
    """Pallas port of LinearClassifier.forward: returns (logits, None).

    X: (batch, n_features)           (extra leading dims are flattened)
    w: (n_features, n_classes)       (PyTorch nn.Linear weight, transposed)
    b: (n_classes,)
    """
    x = X.reshape(X.shape[0], -1)
    bsz, d = x.shape
    n_out = w.shape[1]

    # bf16 inputs halve the dominant HBM read stream; accumulate in f32.
    x = x.astype(jnp.bfloat16)
    w = w.astype(jnp.bfloat16)
    bias = b.reshape(1, n_out).astype(jnp.float32)

    # Batch tile: big enough to amortize the ~0.35 us/step grid overhead,
    # multiple of 16 (bf16 sublane packing), capped so the double-buffered
    # working set fits the smallest default scoped-VMEM budget (v5e: 16 MiB).
    SUBLANE = 16
    vmem_budget = 12 * 1024 * 1024
    row_bytes = 2 * d * 2 + 2 * n_out * 4          # x (bf16, 2 bufs) + out (f32, 2 bufs)
    resident = d * n_out * 2 + n_out * 4           # weight + bias, resident
    tb_cap = max(SUBLANE,
                 ((vmem_budget - resident) // row_bytes) // SUBLANE * SUBLANE)
    tb = max(SUBLANE, min(block_b, _round_up(bsz, SUBLANE), tb_cap))

    out = pl.pallas_call(
        linear_kernel,
        out_shape=jax.ShapeDtypeStruct((bsz, n_out), jnp.float32),
        grid_spec=pl.GridSpec(
            grid=(pl.cdiv(bsz, tb),),
            in_specs=[
                # Batch tile; the partial last tile reads garbage rows whose
                # corresponding output rows are masked out of the store.
                pl.BlockSpec((tb, d), lambda i: (i, 0)),
                pl.BlockSpec((d, n_out), lambda i: (0, 0)),   # weight, resident
                pl.BlockSpec((1, n_out), lambda i: (0, 0)),   # bias, resident
            ],
            out_specs=pl.BlockSpec((tb, n_out), lambda i: (i, 0)),
        ),
        compiler_params=pltpu.CompilerParams(
            # TODO(synk): on v7x switch this axis to pltpu.CORE_PARALLEL to
            # shard batch tiles across both TensorCores.
            dimension_semantics=("parallel",),
        ),
    )(x, w, bias)

    return out, None   # mirrors `return (self.classifier(X), None)`


if __name__ == "__main__":
    key = jax.random.PRNGKey(0)
    kx, kw, kb = jax.random.split(key, 3)

    X = jax.random.normal(kx, (B, N_FEATURES), jnp.float32)
    # nn.Linear parameters, stored as (in_features, out_features) for the kernel.
    w = 0.05 * jax.random.normal(kw, (N_FEATURES, N_CLASSES), jnp.float32)
    b = 0.01 * jax.random.normal(kb, (N_CLASSES,), jnp.float32)

    logits, aux = linear_classifier_forward(X, None, w, b)
    jax.block_until_ready(logits)

    # Reference check against plain JAX (f32); inputs go through bf16 in the
    # kernel, so use a correspondingly loose tolerance.
    ref = X @ w + b
    assert aux is None
    assert logits.shape == (B, N_CLASSES)
    assert jnp.allclose(logits, ref, atol=2e-2, rtol=2e-2), "mismatch vs reference"
    print("KERNEL_OK")
</pallas_src>

<mosaic_0001>
module attributes {stable_mosaic.version = 11 : i64} {
  func.func @linear_kernel(%arg0: i32, %arg1: memref<16x32xbf16, #tpu.memory_space<vmem>>, %arg2: memref<32x4xbf16, #tpu.memory_space<vmem>>, %arg3: memref<1x4xf32, #tpu.memory_space<vmem>>, %arg4: memref<16x4xf32, #tpu.memory_space<vmem>>) attributes {dimension_semantics = [#tpu.dimension_semantics<parallel>], iteration_bounds = array<i64: 1>, scalar_prefetch = 0 : i64, scratch_operands = 0 : i64, tpu.core_type = #tpu.core_type<tc>, window_params = [{transform_indices = @transform_0, window_bounds = array<i64: 16, 32>}, {pipeline_mode = #tpu.pipeline_mode<synchronous>, transform_indices = @transform_1, window_bounds = array<i64: 32, 4>}, {pipeline_mode = #tpu.pipeline_mode<synchronous>, transform_indices = @transform_2, window_bounds = array<i64: 1, 4>}, {transform_indices = @transform_3, window_bounds = array<i64: 16, 4>}]} {
    %c0 = arith.constant 0 : index
    %c0_0 = arith.constant 0 : index
    %0 = vector.load %arg1[%c0, %c0_0] : memref<16x32xbf16, #tpu.memory_space<vmem>>, vector<16x32xbf16>
    %c0_1 = arith.constant 0 : index
    %c0_2 = arith.constant 0 : index
    %1 = vector.load %arg2[%c0_1, %c0_2] : memref<32x4xbf16, #tpu.memory_space<vmem>>, vector<32x4xbf16>
    %cst = arith.constant dense<0.000000e+00> : vector<16x4xf32>
    %2 = tpu.matmul %0, %1, %cst {dimension_numbers = #tpu.dot_dimension_numbers<[1], [0], [0], [1], [0, 0, 1, 1], [], []>} : vector<16x32xbf16>, vector<32x4xbf16>, vector<16x4xf32> -> vector<16x4xf32>
    %c0_3 = arith.constant 0 : index
    %c0_4 = arith.constant 0 : index
    %3 = vector.load %arg3[%c0_3, %c0_4] : memref<1x4xf32, #tpu.memory_space<vmem>>, vector<1x4xf32>
    %4 = vector.broadcast %3 : vector<1x4xf32> to vector<16x4xf32>
    %5 = arith.addf %2, %4 : vector<16x4xf32>
    %c0_5 = arith.constant 0 : index
    %c0_6 = arith.constant 0 : index
    %6 = vector.load %arg4[%c0_5, %c0_6] : memref<16x4xf32, #tpu.memory_space<vmem>>, vector<16x4xf32>
    tpu.vector_store %arg4[%c0_5, %c0_6], %5 {strides = array<i32>} : memref<16x4xf32, #tpu.memory_space<vmem>>, vector<16x4xf32>,
    return
  }
  func.func @transform_0(%arg0: i32) -> (i32, i32) {
    %c0_i32 = arith.constant 0 : i32
    %c0_i32_0 = arith.constant 0 : i32
    return %arg0, %c0_i32 : i32, i32
  }
  func.func @transform_1(%arg0: i32) -> (i32, i32) {
    %c0_i32 = arith.constant 0 : i32
    %c0_i32_0 = arith.constant 0 : i32
    %c0_i32_1 = arith.constant 0 : i32
    return %c0_i32, %c0_i32_0 : i32, i32
  }
  func.func @transform_2(%arg0: i32) -> (i32, i32) {
    %c0_i32 = arith.constant 0 : i32
    %c0_i32_0 = arith.constant 0 : i32
    %c0_i32_1 = arith.constant 0 : i32
    return %c0_i32, %c0_i32_0 : i32, i32
  }
  func.func @transform_3(%arg0: i32) -> (i32, i32) {
    %c0_i32 = arith.constant 0 : i32
    %c0_i32_0 = arith.constant 0 : i32
    return %arg0, %c0_i32 : i32, i32
  }
}

</mosaic_0001>

<bundles_post_ra>
// kernel: linear_classifier_forward.1
= control target key start
LH: loop header
LB: loop body
LE: loop exit
PB: predicated region body
PF: predicated region fallthrough
CT: control target
= control target key end

     0   :  { %8 = vsyncpa [#allocation3], 0  ;;  %v213_v1 = vmov 0.0   ;;  %v50_v3 = vlaneseq  ;;  %vm214_vm0 = vmmov 0   ;;  %v215_v12 = vmov 1966171168   ;;  %s275_s0 = inlined_call_operand.vmem [shape: bf16[2,32], index: 0, kind: input, shape index: {}]   ;;  %s276_s1 = inlined_call_operand.vmem [shape: bf16[32,4], index: 1, kind: input, shape index: {}]   ;;  %s277_s2 = inlined_call_operand.vmem [shape: f32[1,4], index: 2, kind: input, shape index: {}]   ;;  %s278_s3 = inlined_call_operand.hbm [shape: f32[2,4], index: 3, kind: output, shape index: {}]  }
   0x1   :  { %v189_v0 = vld [vmem:[%s276_s1 + $0x8] sm:$0xff]   ;;  %175 = vmatprep.subr.bf16.mxu0 %v213_v1  ;;  %v190_v2 = vld [vmem:[%s276_s1] sm:$0xff]   ;;  %179 = vmatprep.mubr.msk.bf16.mxu0 %vm214_vm0, %v213_v1  ;;  %v48_v13 = vunpack.c.l.s4 %v215_v12  ;;  %vm104_vm1 = vcmask 261120   ;;  %vm149_vm2 = vcmask 31744  }
   0x2   :  { %176 = vmatpush3.bf16.msra.mxu0 %v189_v0  ;;  %v16_v4 = vld [vmem:[%s275_s0] sm:$0x1]  ;;  %v17_v5 = vld [vmem:[%s275_s0 + $0x1] sm:$0x1]  ;;  %v18_v6 = vld [vmem:[%s275_s0 + $0x2] sm:$0x1] }
   0x3   :  { %177 = vmatprep.subr.bf16.mxu0 %v213_v1  ;;  %v19_v7 = vld [vmem:[%s275_s0 + $0x3] sm:$0x1]  ;;  %v20_v8 = vld [vmem:[%s275_s0 + $0x4] sm:$0x1]  ;;  %v21_v9 = vld [vmem:[%s275_s0 + $0x5] sm:$0x1]  ;;  %v43_v15 = vcombine.low %v16_v4, %v17_v5  ;;  %v49_v19 = vunpack.c.0.s8 %v48_v13 }
   0x4   :  { %v22_v10 = vld [vmem:[%s275_s0 + $0x6] sm:$0x1]  ;;  %v23_v11 = vld [vmem:[%s275_s0 + $0x7] sm:$0x1]  ;;  %v51_v14 = vshrl.u32 %v50_v3, 7  ;;  %v44_v16 = vcombine.low %v18_v6, %v19_v7  ;;  %v45_v17 = vcombine.low %v20_v8, %v21_v9 }
   0x5   :  { %v46_v18 = vcombine.low %v22_v10, %v23_v11  ;;  %v168_v30 = vld [vmem:[%s277_s2] ss:$0 sm:$0xff] }
   0x6   :  { %178 = vmatpush3.bf16.msra.mxu0 %v190_v2  ;;  %v52_v20 = vsub.s32 %v49_v19, %v51_v14 }
   0x8   :  { %v53_v21 = vrot.slane %v43_v15, %v52_v20  ;;  %v60_v22 = vrot.slane %v44_v16, %v52_v20  ;;  %v67_v23 = vrot.slane %v45_v17, %v52_v20  ;;  %v74_v24 = vrot.slane %v46_v18, %v52_v20 }
   0xa   :  { %v75_v25 = vcombine.low %v53_v21, %v60_v22  ;;  %v76_v26 = vcombine.low %v67_v23, %v74_v24 }
   0xc   :  { %v83_v27 = vrot.slane %v75_v25, %v52_v20  ;;  %v90_v28 = vrot.slane %v76_v26, %v52_v20 }
   0xe   :  { %v91_v29 = vcombine.low %v83_v27, %v90_v28 }
  0x10   :  { %180 = vmatmul.mubr.msk.bf16.vlgmr.msra.gmra.mxu0 %vm104_vm1, %v91_v29 }
  0xd0   :  { %v142_v31 = vpop.f32.mrf.mxu0 }
  0xd1   :  { %v143_v32 = vadd.f32 %v168_v30, %v142_v31 }
  0xd2   :  { %v181_v33 = vpop.f32.mrf.mxu0 }
  0xd3   :  { %150 = vst.msk [vmem:[#allocation2] sm:$0xff] %vm149_vm2, %v143_v32 }
  0xd4   :  { %v145_v34 = vpop.f32.mrf.mxu0 }
  0xd5   :  { %v146_v35 = vadd.f32 %v168_v30, %v145_v34 }
  0xd6   :  { %v182_v36 = vpop.f32.mrf.mxu0 }
  0xd7   :  { %151 = vst.msk [vmem:[#allocation2 + $0x8] sm:$0xff] %vm149_vm2, %v146_v35 }
  0xd8   :  { %156 = vsyncadd [#allocation3], 224  ;;  %s216_s5 = smov [#allocation2]  }
  0xd9   :  { %s157_s6 = sshll.u32 %s216_s5, 4  ;;  %s158_s6 = int_to_ptr.vmem [resolvable:$true] %s157_s6 }
  0xda   :  { %s191_s7 = scalar_lea.vmem %s158_s6, 32  ;;  %s195_s8 = scalar_lea.vmem %s158_s6, 256 }
  0xdb   :  { %p192_p0 = scmp.ne.s32.totalorder %s158_s6, %s191_s7  ;;  %p196_p1 = scmp.lt.s32.totalorder %s158_s6, %s158_s6 }
  0xdc   :  { %p197_p2 = scmp.lt.s32.totalorder %s195_s8, %s191_s7 }
  0xde   :  { %p198_p3 = por %p197_p2, %p196_p1 }
  0xe0   :  { %p199_p4 = pnand %p198_p3, %p192_p0 }
  0xe2   :  { %202 = shalt.err (!%p199_p4)
}
  0xe3   :  { %s217_s2 = smov 32   ;;  %s218_s9 = smov 2  }
  0xe4   :  { %163 = dma.vmem_to_hbm [thread:$0]  %s158_s6, 32, %s278_s3, [#allocation3], %s217_s2, %s217_s2, %s218_s9  }
  0xe5   :  { %211 = dma.done.wait [#allocation3], 256  }
  0xe6   :  { %212 = vsyncadd [#allocation3], 4294967040 }
  0xe7   :  { %167 = vsyncpa [#allocation3], 1 }

</bundles_post_ra>
